<compile_context>
chip_gen: v6e
topology: v6e:2x2x1
jax: 0.10.0
libtpu: 0.0.40
codegen_flags: <defaults>
</compile_context>

<pallas_src>
import functools

import jax
import jax.numpy as jnp
import numpy as np
from jax.experimental import pallas as pl
from jax.experimental.pallas import tpu as pltpu

_OPS = ("increase", "decrease", "peak", "trough")


def _capped_relu(x, cap):
    return jnp.clip(x - cap, 0.0, 1.0)


def _attend_all_kernel(v_ref, o_ref, *, L):
    v = v_ref[...]                                  # (Bp, Lp) f32, zero padded
    Bp, Lp = v.shape
    col = jax.lax.broadcasted_iota(jnp.int32, (Bp, Lp), 1)

    # v_next[:, j] == v[:, j+1]  (left shift by 1 == circular roll by Lp-1)
    v_next = pltpu.roll(v, shift=Lp - 1, axis=1)
    valid_diff = col < (L - 1)                      # torch loops: j in range(sz-1)

    d_inc = jnp.where(valid_diff, (v_next - v) * 0.1, 0.0)
    r_inc = _capped_relu(d_inc, 0.2)                # 'increase' ret / peak ret1 / trough ret2
    r_dec = _capped_relu(-d_inc, 0.2)               # 'decrease' ret / peak ret2 / trough ret1

    # Shared lane rolls (reuse: roll-by-2 = roll(roll-by-1)); all shifts >= 0.
    inc_r1 = pltpu.roll(r_inc, shift=1, axis=1)      # r_inc[:, j-1]
    inc_r2 = pltpu.roll(inc_r1, shift=1, axis=1)     # r_inc[:, j-2]
    inc_l1 = pltpu.roll(r_inc, shift=Lp - 1, axis=1)  # r_inc[:, j+1]
    dec_r1 = pltpu.roll(r_dec, shift=1, axis=1)
    dec_r2 = pltpu.roll(dec_r1, shift=1, axis=1)
    dec_l1 = pltpu.roll(r_dec, shift=Lp - 1, axis=1)

    # ret[:, L-1] = ret[:, L-2]  (after capped_relu)
    last = col == (L - 1)
    out_inc = jnp.where(last, inc_r1, r_inc)
    out_dec = jnp.where(last, dec_r1, r_dec)

    # peak/trough window:
    #   a = 0.3*ret1[:, j-2] + 0.7*ret1[:, j-1]   (wt1 = [0.3, 0.7])
    #   b = 0.7*ret2[:, j]   + 0.3*ret2[:, j+1]   (wt2 = [0.7, 0.3])
    #   ret[:, j] = sqrt(a * 0.5 * b)  for j in [2, L-3]; then capped_relu(ret*2, 0)
    # The 0.5 is folded into the `a` constants.
    win_mask = (col >= 2) & (col <= (L - 3))

    def _window(r1_m2, r1_m1, r2_0, r2_p1):
        a_half = 0.15 * r1_m2 + 0.35 * r1_m1
        b = 0.7 * r2_0 + 0.3 * r2_p1
        ret = jnp.where(win_mask, jnp.sqrt(a_half * b), 0.0)
        return jnp.clip(ret * 2.0, 0.0, 1.0)        # capped_relu(ret*2, 0)

    out_peak = _window(inc_r2, inc_r1, r_dec, dec_l1)
    out_trough = _window(dec_r2, dec_r1, r_inc, inc_l1)

    o_ref[0] = out_inc
    o_ref[1] = out_dec
    o_ref[2] = out_peak
    o_ref[3] = out_trough


@jax.jit
def attend_all(values):
    """Fused kernel: returns (4, B, L) = [increase, decrease, peak, trough]."""
    values = jnp.asarray(values, jnp.float32)
    B, L = values.shape
    Bp = ((B + 7) // 8) * 8
    Lp = ((L + 127) // 128) * 128
    vp = jnp.pad(values, ((0, Bp - B), (0, Lp - L)))      # single pad op

    kernel = functools.partial(_attend_all_kernel, L=L)
    out = pl.pallas_call(
        kernel,
        out_shape=jax.ShapeDtypeStruct((4, Bp, Lp), jnp.float32),
        in_specs=[pl.BlockSpec(memory_space=pltpu.MemorySpace.VMEM)],
        out_specs=pl.BlockSpec(memory_space=pltpu.MemorySpace.VMEM),
    )(vp)
    return out[:, :B, :L]                                  # single slice op


def attend_module(values, operator_type, inp_length=12):
    """API-compatible per-operator entry point (uses the fused kernel)."""
    assert operator_type in _OPS
    return attend_all(values)[_OPS.index(operator_type)]


# ---------------- pure numpy reference (mirrors the torch loops) ----------------
def _ref_capped_relu(x, cap):
    return np.clip(x - cap, 0.0, 1.0)


def _ref_attend(values, op):
    v = np.asarray(values, np.float32)
    B, L = v.shape
    ret = np.zeros_like(v)
    if op in ("increase", "decrease"):
        for j in range(L - 1):
            d = v[:, j + 1] - v[:, j]
            ret[:, j] = d if op == "increase" else -d
        ret = ret * 0.1
        ret = _ref_capped_relu(ret, 0.2)
        ret[:, L - 1] = ret[:, L - 2]
        return ret
    ret1 = np.zeros_like(v)
    ret2 = np.zeros_like(v)
    wt1 = np.array([0.3, 0.7], np.float32)[None, :]
    wt2 = np.array([0.7, 0.3], np.float32)[None, :]
    for j in range(L - 1):
        inc = 0.1 * (v[:, j + 1] - v[:, j])
        dec = 0.1 * (v[:, j] - v[:, j + 1])
        if op == "peak":
            ret1[:, j], ret2[:, j] = inc, dec
        else:  # trough
            ret1[:, j], ret2[:, j] = dec, inc
    ret1 = _ref_capped_relu(ret1, 0.2)
    ret2 = _ref_capped_relu(ret2, 0.2)
    for j in range(2, L - 2):
        a = np.sum(wt1 * ret1[:, j - 2:j], axis=1)
        b = np.sum(wt2 * ret2[:, j:j + 2], axis=1)
        ret[:, j] = np.sqrt(a * 0.5 * b)
    return _ref_capped_relu(ret * 2.0, 0.0)


if __name__ == "__main__":
    key = jax.random.PRNGKey(0)
    B, L = 2, 12  # inp_length default = 12
    # scale so that some 0.1*diff values exceed the 0.2 threshold
    values = 5.0 * jax.random.normal(key, (B, L), dtype=jnp.float32)

    # One fused launch computes all four operator outputs.
    outs = jax.block_until_ready(attend_all(values))   # (4, B, L)

    vals_np = np.asarray(values)
    outs_np = np.asarray(outs)
    ok = True
    for k, op in enumerate(_OPS):
        ref = _ref_attend(vals_np, op)
        got = outs_np[k]
        if not np.allclose(got, ref, atol=1e-5, rtol=1e-4):
            ok = False
            print(f"MISMATCH for operator_type={op}")
            print("kernel:", got)
            print("ref   :", ref)

    if ok:
        print("KERNEL_OK")
</pallas_src>

<mosaic_0001>
module attributes {stable_mosaic.version = 11 : i64} {
  func.func @_attend_all_kernel(%arg0: memref<8x128xf32, #tpu.memory_space<vmem>>, %arg1: memref<4x8x128xf32, #tpu.memory_space<vmem>>) attributes {dimension_semantics = [], scalar_prefetch = 0 : i64, scratch_operands = 0 : i64, tpu.core_type = #tpu.core_type<tc>} {
    %c0 = arith.constant 0 : index
    %c0_0 = arith.constant 0 : index
    %0 = vector.load %arg0[%c0, %c0_0] : memref<8x128xf32, #tpu.memory_space<vmem>>, vector<8x128xf32>
    %1 = tpu.iota {dimensions = array<i32: 1>} : vector<8x128xi32>
    %c127_i32 = arith.constant 127 : i32
    %2 = tpu.dynamic_rotate %0 by %c127_i32 dim 1 : vector<8x128xf32>, i32 -> vector<8x128xf32>
    %c11_i32 = arith.constant 11 : i32
    %3 = vector.broadcast %c11_i32 : i32 to vector<8x128xi32>
    %4 = arith.cmpi slt, %1, %3 : vector<8x128xi32>
    %5 = arith.subf %2, %0 : vector<8x128xf32>
    %cst = arith.constant 1.000000e-01 : f32
    %6 = vector.broadcast %cst : f32 to vector<8x128xf32>
    %7 = arith.mulf %5, %6 : vector<8x128xf32>
    %cst_1 = arith.constant 0.000000e+00 : f32
    %8 = vector.broadcast %cst_1 : f32 to vector<8x128xf32>
    %9 = arith.select %4, %7, %8 : vector<8x128xi1>, vector<8x128xf32>
    %cst_2 = arith.constant 2.000000e-01 : f32
    %10 = vector.broadcast %cst_2 : f32 to vector<8x128xf32>
    %11 = arith.subf %9, %10 : vector<8x128xf32>
    %cst_3 = arith.constant 0.000000e+00 : f32
    %cst_4 = arith.constant 1.000000e+00 : f32
    %12 = vector.broadcast %cst_3 : f32 to vector<8x128xf32>
    %13 = arith.maximumf %12, %11 : vector<8x128xf32>
    %14 = vector.broadcast %cst_4 : f32 to vector<8x128xf32>
    %15 = arith.minimumf %14, %13 : vector<8x128xf32>
    %cst_5 = arith.constant 0.000000e+00 : f32
    %16 = vector.broadcast %cst_5 : f32 to vector<8x128xf32>
    %17 = arith.subf %16, %9 : vector<8x128xf32>
    %cst_6 = arith.constant 2.000000e-01 : f32
    %18 = vector.broadcast %cst_6 : f32 to vector<8x128xf32>
    %19 = arith.subf %17, %18 : vector<8x128xf32>
    %cst_7 = arith.constant 0.000000e+00 : f32
    %cst_8 = arith.constant 1.000000e+00 : f32
    %20 = vector.broadcast %cst_7 : f32 to vector<8x128xf32>
    %21 = arith.maximumf %20, %19 : vector<8x128xf32>
    %22 = vector.broadcast %cst_8 : f32 to vector<8x128xf32>
    %23 = arith.minimumf %22, %21 : vector<8x128xf32>
    %c1_i32 = arith.constant 1 : i32
    %24 = tpu.dynamic_rotate %15 by %c1_i32 dim 1 : vector<8x128xf32>, i32 -> vector<8x128xf32>
    %c1_i32_9 = arith.constant 1 : i32
    %25 = tpu.dynamic_rotate %24 by %c1_i32_9 dim 1 : vector<8x128xf32>, i32 -> vector<8x128xf32>
    %c127_i32_10 = arith.constant 127 : i32
    %26 = tpu.dynamic_rotate %15 by %c127_i32_10 dim 1 : vector<8x128xf32>, i32 -> vector<8x128xf32>
    %c1_i32_11 = arith.constant 1 : i32
    %27 = tpu.dynamic_rotate %23 by %c1_i32_11 dim 1 : vector<8x128xf32>, i32 -> vector<8x128xf32>
    %c1_i32_12 = arith.constant 1 : i32
    %28 = tpu.dynamic_rotate %27 by %c1_i32_12 dim 1 : vector<8x128xf32>, i32 -> vector<8x128xf32>
    %c127_i32_13 = arith.constant 127 : i32
    %29 = tpu.dynamic_rotate %23 by %c127_i32_13 dim 1 : vector<8x128xf32>, i32 -> vector<8x128xf32>
    %c11_i32_14 = arith.constant 11 : i32
    %30 = vector.broadcast %c11_i32_14 : i32 to vector<8x128xi32>
    %31 = arith.cmpi eq, %1, %30 : vector<8x128xi32>
    %32 = arith.select %31, %24, %15 : vector<8x128xi1>, vector<8x128xf32>
    %33 = arith.select %31, %27, %23 : vector<8x128xi1>, vector<8x128xf32>
    %c2_i32 = arith.constant 2 : i32
    %34 = vector.broadcast %c2_i32 : i32 to vector<8x128xi32>
    %35 = arith.cmpi sge, %1, %34 : vector<8x128xi32>
    %c9_i32 = arith.constant 9 : i32
    %36 = vector.broadcast %c9_i32 : i32 to vector<8x128xi32>
    %37 = arith.cmpi sle, %1, %36 : vector<8x128xi32>
    %38 = arith.andi %35, %37 : vector<8x128xi1>
    %cst_15 = arith.constant 1.500000e-01 : f32
    %39 = vector.broadcast %cst_15 : f32 to vector<8x128xf32>
    %40 = arith.mulf %39, %25 : vector<8x128xf32>
    %cst_16 = arith.constant 3.500000e-01 : f32
    %41 = vector.broadcast %cst_16 : f32 to vector<8x128xf32>
    %42 = arith.mulf %41, %24 : vector<8x128xf32>
    %43 = arith.addf %40, %42 : vector<8x128xf32>
    %cst_17 = arith.constant 0.699999988 : f32
    %44 = vector.broadcast %cst_17 : f32 to vector<8x128xf32>
    %45 = arith.mulf %44, %23 : vector<8x128xf32>
    %cst_18 = arith.constant 3.000000e-01 : f32
    %46 = vector.broadcast %cst_18 : f32 to vector<8x128xf32>
    %47 = arith.mulf %46, %29 : vector<8x128xf32>
    %48 = arith.addf %45, %47 : vector<8x128xf32>
    %49 = arith.mulf %43, %48 : vector<8x128xf32>
    %50 = math.sqrt %49 : vector<8x128xf32>
    %cst_19 = arith.constant 0.000000e+00 : f32
    %51 = vector.broadcast %cst_19 : f32 to vector<8x128xf32>
    %52 = arith.select %38, %50, %51 : vector<8x128xi1>, vector<8x128xf32>
    %cst_20 = arith.constant 2.000000e+00 : f32
    %53 = vector.broadcast %cst_20 : f32 to vector<8x128xf32>
    %54 = arith.mulf %52, %53 : vector<8x128xf32>
    %cst_21 = arith.constant 0.000000e+00 : f32
    %cst_22 = arith.constant 1.000000e+00 : f32
    %55 = vector.broadcast %cst_21 : f32 to vector<8x128xf32>
    %56 = arith.maximumf %55, %54 : vector<8x128xf32>
    %57 = vector.broadcast %cst_22 : f32 to vector<8x128xf32>
    %58 = arith.minimumf %57, %56 : vector<8x128xf32>
    %cst_23 = arith.constant 1.500000e-01 : f32
    %59 = vector.broadcast %cst_23 : f32 to vector<8x128xf32>
    %60 = arith.mulf %59, %28 : vector<8x128xf32>
    %cst_24 = arith.constant 3.500000e-01 : f32
    %61 = vector.broadcast %cst_24 : f32 to vector<8x128xf32>
    %62 = arith.mulf %61, %27 : vector<8x128xf32>
    %63 = arith.addf %60, %62 : vector<8x128xf32>
    %cst_25 = arith.constant 0.699999988 : f32
    %64 = vector.broadcast %cst_25 : f32 to vector<8x128xf32>
    %65 = arith.mulf %64, %15 : vector<8x128xf32>
    %cst_26 = arith.constant 3.000000e-01 : f32
    %66 = vector.broadcast %cst_26 : f32 to vector<8x128xf32>
    %67 = arith.mulf %66, %26 : vector<8x128xf32>
    %68 = arith.addf %65, %67 : vector<8x128xf32>
    %69 = arith.mulf %63, %68 : vector<8x128xf32>
    %70 = math.sqrt %69 : vector<8x128xf32>
    %cst_27 = arith.constant 0.000000e+00 : f32
    %71 = vector.broadcast %cst_27 : f32 to vector<8x128xf32>
    %72 = arith.select %38, %70, %71 : vector<8x128xi1>, vector<8x128xf32>
    %cst_28 = arith.constant 2.000000e+00 : f32
    %73 = vector.broadcast %cst_28 : f32 to vector<8x128xf32>
    %74 = arith.mulf %72, %73 : vector<8x128xf32>
    %cst_29 = arith.constant 0.000000e+00 : f32
    %cst_30 = arith.constant 1.000000e+00 : f32
    %75 = vector.broadcast %cst_29 : f32 to vector<8x128xf32>
    %76 = arith.maximumf %75, %74 : vector<8x128xf32>
    %77 = vector.broadcast %cst_30 : f32 to vector<8x128xf32>
    %78 = arith.minimumf %77, %76 : vector<8x128xf32>
    %c0_31 = arith.constant 0 : index
    %c0_32 = arith.constant 0 : index
    %c0_33 = arith.constant 0 : index
    %79 = vector.load %arg1[%c0_31, %c0_32, %c0_33] : memref<4x8x128xf32, #tpu.memory_space<vmem>>, vector<1x8x128xf32>
    %80 = vector.shape_cast %79 : vector<1x8x128xf32> to vector<8x128xf32>
    %81 = vector.shape_cast %32 : vector<8x128xf32> to vector<1x8x128xf32>
    tpu.vector_store %arg1[%c0_31, %c0_32, %c0_33], %81 {strides = array<i32>} : memref<4x8x128xf32, #tpu.memory_space<vmem>>, vector<1x8x128xf32>,
    %c1 = arith.constant 1 : index
    %c0_34 = arith.constant 0 : index
    %c0_35 = arith.constant 0 : index
    %82 = vector.load %arg1[%c1, %c0_34, %c0_35] : memref<4x8x128xf32, #tpu.memory_space<vmem>>, vector<1x8x128xf32>
    %83 = vector.shape_cast %82 : vector<1x8x128xf32> to vector<8x128xf32>
    %84 = vector.shape_cast %33 : vector<8x128xf32> to vector<1x8x128xf32>
    tpu.vector_store %arg1[%c1, %c0_34, %c0_35], %84 {strides = array<i32>} : memref<4x8x128xf32, #tpu.memory_space<vmem>>, vector<1x8x128xf32>,
    %c2 = arith.constant 2 : index
    %c0_36 = arith.constant 0 : index
    %c0_37 = arith.constant 0 : index
    %85 = vector.load %arg1[%c2, %c0_36, %c0_37] : memref<4x8x128xf32, #tpu.memory_space<vmem>>, vector<1x8x128xf32>
    %86 = vector.shape_cast %85 : vector<1x8x128xf32> to vector<8x128xf32>
    %87 = vector.shape_cast %58 : vector<8x128xf32> to vector<1x8x128xf32>
    tpu.vector_store %arg1[%c2, %c0_36, %c0_37], %87 {strides = array<i32>} : memref<4x8x128xf32, #tpu.memory_space<vmem>>, vector<1x8x128xf32>,
    %c3 = arith.constant 3 : index
    %c0_38 = arith.constant 0 : index
    %c0_39 = arith.constant 0 : index
    %88 = vector.load %arg1[%c3, %c0_38, %c0_39] : memref<4x8x128xf32, #tpu.memory_space<vmem>>, vector<1x8x128xf32>
    %89 = vector.shape_cast %88 : vector<1x8x128xf32> to vector<8x128xf32>
    %90 = vector.shape_cast %78 : vector<8x128xf32> to vector<1x8x128xf32>
    tpu.vector_store %arg1[%c3, %c0_38, %c0_39], %90 {strides = array<i32>} : memref<4x8x128xf32, #tpu.memory_space<vmem>>, vector<1x8x128xf32>,
    return
  }
}

</mosaic_0001>

<bundles_post_ra>
// kernel: attend_all.1
= control target key start
LH: loop header
LB: loop body
LE: loop exit
PB: predicated region body
PF: predicated region fallthrough
CT: control target
= control target key end

     0   :  { %s100_s8 = smov 127   ;;  %v9_v1 = vlaneseq  ;;  %s101_s9 = smov 1   ;;  %s135_s0 = inlined_call_operand.vmem [shape: f32[8,128], index: 0, kind: input, shape index: {}]   ;;  %s136_s1 = inlined_call_operand.vmem [shape: f32[4,8,128], index: 1, kind: output, shape index: {}]  }
   0x1   :  { %v8_v0 = vld [vmem:[%s135_s0] sm:$0xff] }
   0x2   :  { %11 = vrot.lane.b32.xlu0 %v8_v0, %s100_s8  ;;  %v10_v2 = vand.u32 127, %v9_v1 }
   0x4   :  { %vm13_vm0 = vcmp.lt.s32.totalorder %v10_v2, 11  ;;  %vm36_vm1 = vcmp.eq.s32.totalorder %v10_v2, 11  ;;  %vm39_vm2 = vcmp.ge.s32.totalorder %v10_v2, 2  ;;  %vm40_vm3 = vcmp.le.s32.totalorder %v10_v2, 9 }
   0x5   :  { %vm121_vm4 = vmand %vm39_vm2, %vm40_vm3 }
  0x74   :  { %v12_v3 = vpop.permute.xlu0 %11 }
  0x75   :  { %v14_v4 = vsub.f32 %v12_v3, %v8_v0 }
  0x77   :  { %v15_v5 = vmul.f32 0.1, %v14_v4 }
  0x79   :  { %v16_v6 = vsel %vm13_vm0, %v15_v5, 0.0 }
  0x7a   :  { %v89_v7 = vadd.f32 -0.2, %v16_v6  ;;  %v20_v8 = vsub.f32 0.0, %v16_v6 }
  0x7c   :  { %v18_v9 = vmax.f32 %v89_v7, 0.0  ;;  %v90_v10 = vadd.f32 -0.2, %v20_v8 }
  0x7e   :  { %v19_v11 = vmin.f32 %v18_v9, 1.0  ;;  %v22_v12 = vmax.f32 %v90_v10, 0.0 }
  0x80   :  { %v23_v13 = vmin.f32 %v22_v12, 1.0  ;;  %24 = vrot.lane.b32.xlu0 %v19_v11, %s101_s9  ;;  %v63_v32 = vmul.f32 0.7, %v19_v11 }
  0x82   :  { %30 = vrot.lane.b32.xlu1 %v23_v13, %s101_s9  ;;  %v45_v23 = vmul.f32 0.7, %v23_v13 }
  0x84   :  { %28 = vrot.lane.b32.xlu0 %v19_v11, %s100_s8 }
  0x88   :  { %34 = vrot.lane.b32.xlu0 %v23_v13, %s100_s8 }
  0xf2   :  { %v25_v14 = vpop.permute.xlu0 %24 }
  0xf3   :  { %v37_v15 = vsel %vm36_vm1, %v25_v14, %v19_v11  ;;  %26 = vrot.lane.b32.xlu1 %v25_v14, %s101_s9  ;;  %v43_v22 = vmul.f32 0.35, %v25_v14 }
  0xf4   :  { %78 = vst [vmem:[%s136_s1] sm:$0xff] %v37_v15  ;;  %v31_v16 = vpop.permute.xlu1 %30 }
  0xf5   :  { %v38_v17 = vsel %vm36_vm1, %v31_v16, %v23_v13  ;;  %v61_v31 = vmul.f32 0.35, %v31_v16 }
  0xf6   :  { %91 = vst [vmem:[%s136_s1 + $0x8] sm:$0xff] %v38_v17  ;;  %v29_v18 = vpop.permute.xlu0 %28 }
  0xf7   :  { %32 = vrot.lane.b32.xlu1 %v31_v16, %s101_s9  ;;  %v64_v27 = vmul.f32 0.3, %v29_v18 }
  0xf9   :  { %v65_v33 = vadd.f32 %v64_v27, %v63_v32 }
  0xfa   :  { %v35_v19 = vpop.permute.xlu0 %34 }
  0xfb   :  { %v46_v20 = vmul.f32 0.3, %v35_v19 }
  0xfd   :  { %v47_v25 = vadd.f32 %v46_v20, %v45_v23 }
 0x165   :  { %v27_v21 = vpop.permute.xlu1 %26 }
 0x166   :  { %v42_v24 = vmul.f32 0.15, %v27_v21 }
 0x168   :  { %v44_v26 = vadd.f32 %v43_v22, %v42_v24 }
 0x169   :  { %v33_v28 = vpop.permute.xlu1 %32 }
 0x16a   :  { %v48_v29 = vmul.f32 %v47_v25, %v44_v26  ;;  %v60_v30 = vmul.f32 0.15, %v33_v28 }
 0x16c   :  { %96 = vrsqrt.f32 %v48_v29  ;;  %v62_v34 = vadd.f32 %v61_v31, %v60_v30  ;;  %vm51_vm5 = vcmp.eq.f32.partialorder %v48_v29, inf  ;;  %v54_v39 = vand.u32 2147483648, %v48_v29 }
 0x16d   :  { %vm53_vm6 = vcmp.eq.f32.partialorder %v48_v29, 0.0 }
 0x16e   :  { %v66_v35 = vmul.f32 %v65_v33, %v62_v34 }
 0x170   :  { %98 = vrsqrt.f32 %v66_v35  ;;  %vm69_vm7 = vcmp.eq.f32.partialorder %v66_v35, inf  ;;  %v72_v46 = vand.u32 2147483648, %v66_v35  ;;  %vm71_vm8 = vcmp.eq.f32.partialorder %v66_v35, 0.0 }
 0x179   :  { %v97_v36 = vpop.eup %96 }
 0x17a   :  { %v50_v37 = vmul.f32 %v97_v36, %v48_v29 }
 0x17c   :  { %v52_v40 = vsel %vm51_vm5, %v48_v29, %v50_v37 }
 0x17d   :  { %v55_v41 = vsel %vm53_vm6, %v54_v39, %v52_v40  ;;  %v99_v42 = vpop.eup %98 }
 0x17e   :  { %v56_v43 = vsel %vm121_vm4, %v55_v41, 0.0  ;;  %v68_v45 = vmul.f32 %v99_v42, %v66_v35 }
 0x17f   :  { %v57_v44 = vmul.f32 2.0, %v56_v43 }
 0x180   :  { %v70_v48 = vsel %vm69_vm7, %v66_v35, %v68_v45 }
 0x181   :  { %v58_v47 = vmax.f32 %v57_v44, 0.0  ;;  %v73_v49 = vsel %vm71_vm8, %v72_v46, %v70_v48 }
 0x182   :  { %v74_v51 = vsel %vm121_vm4, %v73_v49, 0.0 }
 0x183   :  { %v59_v50 = vmin.f32 %v58_v47, 1.0  ;;  %v75_v52 = vmul.f32 2.0, %v74_v51 }
 0x185   :  { %92 = vst [vmem:[%s136_s1 + $0x10] sm:$0xff] %v59_v50  ;;  %v76_v53 = vmax.f32 %v75_v52, 0.0 }
 0x187   :  { %v77_v54 = vmin.f32 %v76_v53, 1.0 }
 0x189   :  { %93 = vst [vmem:[%s136_s1 + $0x18] sm:$0xff] %v77_v54 }

</bundles_post_ra>
